<compile_context>
chip_gen: v7x
topology: tpu7x:2x2x1
jax: 0.10.0
libtpu: 0.0.40
codegen_flags: <defaults>
</compile_context>

<pallas_src>
import functools

import jax
import jax.numpy as jnp
from jax.experimental import pallas as pl
from jax.experimental.pallas import tpu as pltpu


def _se_kernel(x_ref, w1t_ref, b1_ref, w2t_ref, b2_ref, o_ref, *, inv_hw):
    # x_ref: (Bn, C, HW)  w1t: (C, S)  b1: (1, S)  w2t: (S, C)  b2: (1, C)
    x = x_ref[...]

    # Global average pool over spatial dims -> (Bn, C) in f32.
    # Accumulate in f32 via the reduce's dtype (no full-tile f32 copy of x),
    # then scale by 1/HW (trace-time constant).
    pooled = jnp.sum(x, axis=2, dtype=jnp.float32) * inv_hw

    # fc1 (1x1 conv == matmul) + SiLU, batched over Bn samples.
    h = jnp.dot(pooled, w1t_ref[...], preferred_element_type=jnp.float32) + b1_ref[...]
    h = h * jax.nn.sigmoid(h)  # SiLU

    # fc2 + Sigmoid -> per-channel scale (Bn, C).
    s = jnp.dot(h, w2t_ref[...], preferred_element_type=jnp.float32) + b2_ref[...]
    s = jax.nn.sigmoid(s)

    # Broadcast-multiply scale over spatial positions; keep the streaming
    # multiply + store in the input dtype (bf16 stays bf16 end-to-end).
    o_ref[...] = (s.astype(x.dtype)[:, :, None] * x).astype(o_ref.dtype)


def _tpu_vmem_limits():
    """One source of truth for the scoped VMEM limit and the tile budget."""
    try:
        cap = int(getattr(pltpu.get_tpu_info(), "vmem_capacity_bytes", 128 << 20))
    except Exception:  # pragma: no cover - defensive (e.g. unusual backends)
        cap = 128 << 20
    if cap <= (64 << 20):       # v7x-class: 64 MiB physical per TC
        limit = 48 << 20
    else:                       # v5e / v6e: 128 MiB physical
        limit = 64 << 20
    # Headroom for weights/biases, f32 temporaries and compiler scratch.
    tile_budget = limit - (8 << 20)
    return limit, tile_budget


def _num_tensorcores():
    """Best-effort TensorCore count (v7x has 2/chip, v5e/v6e have 1)."""
    try:
        info = pltpu.get_tpu_info()
        for name in ("num_tensorcores", "tensorcore_count", "num_cores", "core_count"):
            v = getattr(info, name, None)
            if isinstance(v, int) and v > 0:
                return v
    except Exception:  # pragma: no cover
        pass
    return 1


def _choose_bn(n, per_sample_bytes, tile_budget_bytes, num_cores,
               target_tile_bytes=2 << 20, min_steps_per_core=2):
    """Pick Bn (samples per grid step), a divisor of n.

    Constraints (in priority order):
      * VMEM: 2 (double-buffer) * 2 (in + out) * Bn * per_sample <= tile budget.
      * Target ~1-2 MiB tiles so the grid stays deep enough to pipeline, while
        amortizing the ~0.35 us/step fixed overhead for tiny per-sample tiles.
      * On multi-TC chips keep grid depth >= num_cores * min_steps_per_core so
        both cores get several steps under dimension_semantics=("parallel",).
    """
    max_bn = max(1, int(tile_budget_bytes // (4 * per_sample_bytes)))
    target_bn = max(1, int(target_tile_bytes // per_sample_bytes))
    cap = min(max_bn, target_bn, n)
    min_grid = num_cores * min_steps_per_core if num_cores > 1 else 1
    if min_grid > 1 and n >= min_grid:
        cap = min(cap, max(1, n // min_grid))
    cap = max(1, cap)
    for bn in range(cap, 0, -1):
        if n % bn == 0:
            return bn
    return 1


def squeeze_excitation(x, w1, b1, w2, b2):
    """x: (N, C, H, W); w1: (S, C); b1: (S,); w2: (C, S); b2: (C,)."""
    N, C, H, W = x.shape
    S = w1.shape[0]
    HW = H * W

    # Flatten spatial dims only (no pad: full-extent last dim in the BlockSpec
    # keeps the store legal; a masked tail vst is far cheaper than the extra
    # HBM read+write passes a pad/slice pair would add).
    x_flat = x.reshape(N, C, HW)

    itemsize = jnp.dtype(x.dtype).itemsize
    per_sample_bytes = C * HW * itemsize
    vmem_limit, tile_budget = _tpu_vmem_limits()
    Bn = _choose_bn(N, per_sample_bytes, tile_budget, _num_tensorcores())
    grid_n = N // Bn

    # Pre-transpose weights so the kernel does (Bn,C)@(C,S) and (Bn,S)@(S,C).
    w1t = jnp.asarray(w1, jnp.float32).T           # (C, S)
    w2t = jnp.asarray(w2, jnp.float32).T           # (S, C)
    b1r = jnp.asarray(b1, jnp.float32).reshape(1, S)
    b2r = jnp.asarray(b2, jnp.float32).reshape(1, C)

    kernel = functools.partial(_se_kernel, inv_hw=1.0 / float(HW))

    out_flat = pl.pallas_call(
        kernel,
        out_shape=jax.ShapeDtypeStruct((N, C, HW), x.dtype),
        grid_spec=pltpu.PrefetchScalarGridSpec(
            num_scalar_prefetch=0,
            grid=(grid_n,),
            in_specs=[
                pl.BlockSpec((Bn, C, HW), lambda n: (n, 0, 0)),  # x tile (Bn samples)
                pl.BlockSpec((C, S), lambda n: (0, 0)),          # fc1 weight^T (resident)
                pl.BlockSpec((1, S), lambda n: (0, 0)),          # fc1 bias
                pl.BlockSpec((S, C), lambda n: (0, 0)),          # fc2 weight^T (resident)
                pl.BlockSpec((1, C), lambda n: (0, 0)),          # fc2 bias
            ],
            out_specs=pl.BlockSpec((Bn, C, HW), lambda n: (n, 0, 0)),
        ),
        compiler_params=pltpu.CompilerParams(
            dimension_semantics=("parallel",),
            vmem_limit_bytes=vmem_limit,
        ),
    )(x_flat, w1t, b1r, w2t, b2r)

    return out_flat.reshape(N, C, H, W)


def _reference(x, w1, b1, w2, b2):
    pooled = jnp.mean(x, axis=(2, 3), keepdims=True)            # (N, C, 1, 1)
    h = jnp.einsum("sc,ncij->nsij", w1, pooled) + b1[None, :, None, None]
    h = h * jax.nn.sigmoid(h)
    s = jnp.einsum("cs,nsij->ncij", w2, h) + b2[None, :, None, None]
    s = jax.nn.sigmoid(s)
    return s * x


if __name__ == "__main__":
    key = jax.random.PRNGKey(0)
    k_x, k_w1, k_b1, k_w2, k_b2 = jax.random.split(key, 5)

    # Module hyper-params: input_c=8, expand_c=16  =>  squeeze_c = 8 // 4 = 2
    input_c = 8
    expand_c = 16
    squeeze_c = input_c // 4

    N, H, W = 2, 16, 16
    x = jax.random.normal(k_x, (N, expand_c, H, W), dtype=jnp.float32)

    # Deterministic synthetic parameters (shapes match nn.Conv2d(.., 1) kernels).
    w1 = jax.random.normal(k_w1, (squeeze_c, expand_c), dtype=jnp.float32) * 0.1
    b1 = jax.random.normal(k_b1, (squeeze_c,), dtype=jnp.float32) * 0.1
    w2 = jax.random.normal(k_w2, (expand_c, squeeze_c), dtype=jnp.float32) * 0.1
    b2 = jax.random.normal(k_b2, (expand_c,), dtype=jnp.float32) * 0.1

    out = squeeze_excitation(x, w1, b1, w2, b2)
    jax.block_until_ready(out)

    ref = _reference(x, w1, b1, w2, b2)
    assert jnp.allclose(out, ref, atol=1e-5, rtol=1e-5), "mismatch vs reference"

    print("KERNEL_OK")
</pallas_src>

<mosaic_0001>
module attributes {stable_mosaic.version = 11 : i64} {
  func.func @_se_kernel(%arg0: i32, %arg1: memref<2x16x256xf32, #tpu.memory_space<vmem>>, %arg2: memref<16x2xf32, #tpu.memory_space<vmem>>, %arg3: memref<1x2xf32, #tpu.memory_space<vmem>>, %arg4: memref<2x16xf32, #tpu.memory_space<vmem>>, %arg5: memref<1x16xf32, #tpu.memory_space<vmem>>, %arg6: memref<2x16x256xf32, #tpu.memory_space<vmem>>) attributes {dimension_semantics = [#tpu.dimension_semantics<parallel>], iteration_bounds = array<i64: 1>, scalar_prefetch = 0 : i64, scratch_operands = 0 : i64, tpu.core_type = #tpu.core_type<tc>, window_params = [{transform_indices = @transform_0, window_bounds = array<i64: 2, 16, 256>}, {pipeline_mode = #tpu.pipeline_mode<synchronous>, transform_indices = @transform_1, window_bounds = array<i64: 16, 2>}, {pipeline_mode = #tpu.pipeline_mode<synchronous>, transform_indices = @transform_2, window_bounds = array<i64: 1, 2>}, {pipeline_mode = #tpu.pipeline_mode<synchronous>, transform_indices = @transform_3, window_bounds = array<i64: 2, 16>}, {pipeline_mode = #tpu.pipeline_mode<synchronous>, transform_indices = @transform_4, window_bounds = array<i64: 1, 16>}, {transform_indices = @transform_5, window_bounds = array<i64: 2, 16, 256>}]} {
    %c0 = arith.constant 0 : index
    %c0_0 = arith.constant 0 : index
    %c0_1 = arith.constant 0 : index
    %0 = vector.load %arg1[%c0, %c0_0, %c0_1] : memref<2x16x256xf32, #tpu.memory_space<vmem>>, vector<2x16x256xf32>
    %cst = arith.constant dense<0.000000e+00> : vector<2x16xf32>
    %1 = vector.multi_reduction <add>, %0, %cst [2] : vector<2x16x256xf32> to vector<2x16xf32>
    %cst_2 = arith.constant 3.906250e-03 : f32
    %2 = vector.broadcast %cst_2 : f32 to vector<2x16xf32>
    %3 = arith.mulf %1, %2 : vector<2x16xf32>
    %c0_3 = arith.constant 0 : index
    %c0_4 = arith.constant 0 : index
    %4 = vector.load %arg2[%c0_3, %c0_4] : memref<16x2xf32, #tpu.memory_space<vmem>>, vector<16x2xf32>
    %cst_5 = arith.constant dense<0.000000e+00> : vector<2x2xf32>
    %5 = tpu.matmul %3, %4, %cst_5 {dimension_numbers = #tpu.dot_dimension_numbers<[1], [0], [0], [1], [0, 0, 1, 1], [], []>} : vector<2x16xf32>, vector<16x2xf32>, vector<2x2xf32> -> vector<2x2xf32>
    %c0_6 = arith.constant 0 : index
    %c0_7 = arith.constant 0 : index
    %6 = vector.load %arg3[%c0_6, %c0_7] : memref<1x2xf32, #tpu.memory_space<vmem>>, vector<1x2xf32>
    %7 = vector.broadcast %6 : vector<1x2xf32> to vector<2x2xf32>
    %8 = arith.addf %5, %7 : vector<2x2xf32>
    %9 = arith.negf %8 : vector<2x2xf32>
    %10 = math.exp %9 : vector<2x2xf32>
    %cst_8 = arith.constant 1.000000e+00 : f32
    %11 = vector.broadcast %cst_8 : f32 to vector<2x2xf32>
    %12 = arith.addf %11, %10 : vector<2x2xf32>
    %13 = arith.divf %11, %12 : vector<2x2xf32>
    %14 = arith.mulf %8, %13 : vector<2x2xf32>
    %c0_9 = arith.constant 0 : index
    %c0_10 = arith.constant 0 : index
    %15 = vector.load %arg4[%c0_9, %c0_10] : memref<2x16xf32, #tpu.memory_space<vmem>>, vector<2x16xf32>
    %cst_11 = arith.constant dense<0.000000e+00> : vector<2x16xf32>
    %16 = tpu.matmul %14, %15, %cst_11 {dimension_numbers = #tpu.dot_dimension_numbers<[1], [0], [0], [1], [0, 0, 1, 1], [], []>} : vector<2x2xf32>, vector<2x16xf32>, vector<2x16xf32> -> vector<2x16xf32>
    %c0_12 = arith.constant 0 : index
    %c0_13 = arith.constant 0 : index
    %17 = vector.load %arg5[%c0_12, %c0_13] : memref<1x16xf32, #tpu.memory_space<vmem>>, vector<1x16xf32>
    %18 = vector.broadcast %17 : vector<1x16xf32> to vector<2x16xf32>
    %19 = arith.addf %16, %18 : vector<2x16xf32>
    %20 = arith.negf %19 : vector<2x16xf32>
    %21 = math.exp %20 : vector<2x16xf32>
    %cst_14 = arith.constant 1.000000e+00 : f32
    %22 = vector.broadcast %cst_14 : f32 to vector<2x16xf32>
    %23 = arith.addf %22, %21 : vector<2x16xf32>
    %24 = arith.divf %22, %23 : vector<2x16xf32>
    %25 = vector.shape_cast %24 : vector<2x16xf32> to vector<2x16x1xf32>
    %26 = vector.broadcast %25 : vector<2x16x1xf32> to vector<2x16x256xf32>
    %27 = arith.mulf %26, %0 : vector<2x16x256xf32>
    %c0_15 = arith.constant 0 : index
    %c0_16 = arith.constant 0 : index
    %c0_17 = arith.constant 0 : index
    %28 = vector.load %arg6[%c0_15, %c0_16, %c0_17] : memref<2x16x256xf32, #tpu.memory_space<vmem>>, vector<2x16x256xf32>
    tpu.vector_store %arg6[%c0_15, %c0_16, %c0_17], %27 {strides = array<i32>} : memref<2x16x256xf32, #tpu.memory_space<vmem>>, vector<2x16x256xf32>,
    return
  }
  func.func @transform_0(%arg0: i32) -> (i32, i32, i32) {
    %c0_i32 = arith.constant 0 : i32
    %c0_i32_0 = arith.constant 0 : i32
    %c0_i32_1 = arith.constant 0 : i32
    return %arg0, %c0_i32, %c0_i32_0 : i32, i32, i32
  }
  func.func @transform_1(%arg0: i32) -> (i32, i32) {
    %c0_i32 = arith.constant 0 : i32
    %c0_i32_0 = arith.constant 0 : i32
    %c0_i32_1 = arith.constant 0 : i32
    return %c0_i32, %c0_i32_0 : i32, i32
  }
  func.func @transform_2(%arg0: i32) -> (i32, i32) {
    %c0_i32 = arith.constant 0 : i32
    %c0_i32_0 = arith.constant 0 : i32
    %c0_i32_1 = arith.constant 0 : i32
    return %c0_i32, %c0_i32_0 : i32, i32
  }
  func.func @transform_3(%arg0: i32) -> (i32, i32) {
    %c0_i32 = arith.constant 0 : i32
    %c0_i32_0 = arith.constant 0 : i32
    %c0_i32_1 = arith.constant 0 : i32
    return %c0_i32, %c0_i32_0 : i32, i32
  }
  func.func @transform_4(%arg0: i32) -> (i32, i32) {
    %c0_i32 = arith.constant 0 : i32
    %c0_i32_0 = arith.constant 0 : i32
    %c0_i32_1 = arith.constant 0 : i32
    return %c0_i32, %c0_i32_0 : i32, i32
  }
  func.func @transform_5(%arg0: i32) -> (i32, i32, i32) {
    %c0_i32 = arith.constant 0 : i32
    %c0_i32_0 = arith.constant 0 : i32
    %c0_i32_1 = arith.constant 0 : i32
    return %arg0, %c0_i32, %c0_i32_0 : i32, i32, i32
  }
}

</mosaic_0001>

<bundles_post_ra>
// kernel: tpu_custom_call.1
= control target key start
LH: loop header
LB: loop body
LE: loop exit
PB: predicated region body
PF: predicated region fallthrough
CT: control target
= control target key end

     0   :  { %10 = vsyncpa [#allocation3], 0  ;;  %s714_s0 = inlined_call_operand.hbm [shape: f32[2,16,256], index: 0, kind: input, shape index: {}]   ;;  %s715_s1 = inlined_call_operand.hbm [shape: f32[16,2], index: 1, kind: input, shape index: {}]   ;;  %s716_s2 = inlined_call_operand.hbm [shape: f32[1,2], index: 2, kind: input, shape index: {}]   ;;  %s717_s3 = inlined_call_operand.hbm [shape: f32[2,16], index: 3, kind: input, shape index: {}]   ;;  %s718_s4 = inlined_call_operand.hbm [shape: f32[1,16], index: 4, kind: input, shape index: {}]   ;;  %s719_s5 = inlined_call_operand.hbm [shape: f32[2,16,256], index: 5, kind: output, shape index: {}]  }
   0x1   :  { %11 = vsyncpa [#allocation6], 0 }
   0x2   :  { %12 = vsyncpa [#allocation9], 0 }
   0x3   :  { %13 = vsyncpa [#allocation4], 0  ;;  %s561_s18 = smov [#allocation5]   ;;  %s421_s22 = scalar_lea.hbm %s715_s1, 256 }
   0x4   :  { %s31_s19 = sshll.u32 %s561_s18, 4  ;;  %p422_p0 = scmp.ne.s32.totalorder %s715_s1, %s421_s22  ;;  %s32_s19 = int_to_ptr.vmem [resolvable:$true] %s31_s19 }
   0x5   :  { %p425_p1 = scmp.lt.u32.totalorder %s421_s22, %s715_s1 }
   0x7   :  { %p427_p2 = pnand %p425_p1, %p422_p0 }
   0x9   :  { %430 = shalt.err (!%p427_p2)
}
   0xa   :  { %s431_s27 = scalar_lea.vmem %s32_s19, 256  ;;  %p436_p4 = scmp.lt.s32.totalorder %s32_s19, %s32_s19 }
   0xb   :  { %p432_p3 = scmp.ne.s32.totalorder %s32_s19, %s431_s27  ;;  %p437_p5 = scmp.lt.s32.totalorder %s431_s27, %s431_s27 }
   0xd   :  { %p438_p6 = por %p437_p5, %p436_p4 }
   0xf   :  { %p439_p7 = pnand %p438_p6, %p432_p3 }
  0x11   :  { %442 = shalt.err (!%p439_p7)
}
  0x12   :  { %s562_s28 = smov 128   ;;  %s563_s29 = smov 8  }
  0x13   :  { %37 = dma.hbm_to_vmem [thread:$0]  %s715_s1, 256, %s32_s19, [#allocation6], %s562_s28, %s562_s28, %s563_s29  }
  0x14   :  { %s564_s7 = smov [#allocation8]   ;;  %s565_s9 = smov [#allocation2]  }
  0x15   :  { %s54_s8 = sshll.u32 %s564_s7, 4  ;;  %s19_s10 = sshll.u32 %s565_s9, 4  ;;  %s55_s8 = int_to_ptr.vmem [resolvable:$true] %s54_s8  ;;  %s20_s10 = int_to_ptr.vmem [resolvable:$true] %s19_s10 }
  0x16   :  { %s443_s13 = scalar_lea.hbm %s717_s3, 32 }
  0x17   :  { %p444_p8 = scmp.ne.s32.totalorder %s717_s3, %s443_s13  ;;  %p447_p9 = scmp.lt.u32.totalorder %s443_s13, %s717_s3 }
  0x19   :  { %p449_p10 = pnand %p447_p9, %p444_p8 }
  0x1b   :  { %452 = shalt.err (!%p449_p10)
}
  0x1c   :  { %s453_s1 = scalar_lea.vmem %s55_s8, 32  ;;  %p458_p12 = scmp.lt.s32.totalorder %s55_s8, %s55_s8 }
  0x1d   :  { %p454_p11 = scmp.ne.s32.totalorder %s55_s8, %s453_s1  ;;  %p459_p13 = scmp.lt.s32.totalorder %s453_s1, %s453_s1 }
  0x1f   :  { %p460_p0 = por %p459_p13, %p458_p12 }
  0x21   :  { %p461_p1 = pnand %p460_p0, %p454_p11 }
  0x23   :  { %464 = shalt.err (!%p461_p1)
}
  0x24   :  { %57 = dma.hbm_to_vmem [thread:$0]  %s717_s3, 32, %s55_s8, [#allocation9]  }
  0x25   :  { %s465_s22 = scalar_lea.hbm %s714_s0, 1024 }
  0x26   :  { %p466_p2 = scmp.ne.s32.totalorder %s714_s0, %s465_s22  ;;  %p469_p3 = scmp.lt.u32.totalorder %s465_s22, %s714_s0 }
  0x28   :  { %p471_p4 = pnand %p469_p3, %p466_p2 }
  0x2a   :  { %474 = shalt.err (!%p471_p4)
}
  0x2b   :  { %s475_s27 = scalar_lea.vmem %s20_s10, 1024  ;;  %p480_p6 = scmp.lt.s32.totalorder %s20_s10, %s20_s10 }
  0x2c   :  { %p476_p5 = scmp.ne.s32.totalorder %s20_s10, %s475_s27  ;;  %p481_p7 = scmp.lt.s32.totalorder %s475_s27, %s475_s27 }
  0x2e   :  { %p482_p8 = por %p481_p7, %p480_p6 }
  0x30   :  { %p483_p9 = pnand %p482_p8, %p476_p5 }
  0x32   :  { %486 = shalt.err (!%p483_p9)
}
  0x33   :  { %s566_s3 = smov 256   ;;  %s567_s28 = smov 16  }
  0x34   :  { %25 = dma.hbm_to_vmem [thread:$0]  %s714_s0, 1024, %s20_s10, [#allocation3], %s566_s3, %s566_s3, %s567_s28  }
  0x35   :  { %s568_s6 = smov [#allocation7]   ;;  %s569_s8 = smov [#allocation10]  }
  0x36   :  { %s44_s7 = sshll.u32 %s568_s6, 4  ;;  %s64_s9 = sshll.u32 %s569_s8, 4  ;;  %s45_s7 = int_to_ptr.vmem [resolvable:$true] %s44_s7  ;;  %s65_s9 = int_to_ptr.vmem [resolvable:$true] %s64_s9 }
  0x37   :  { %s487_s13 = scalar_lea.hbm %s716_s2, 16 }
  0x38   :  { %p488_p10 = scmp.ne.s32.totalorder %s716_s2, %s487_s13  ;;  %p491_p11 = scmp.lt.u32.totalorder %s487_s13, %s716_s2 }
  0x3a   :  { %p493_p12 = pnand %p491_p11, %p488_p10 }
  0x3c   :  { %496 = shalt.err (!%p493_p12)
}
  0x3d   :  { %s497_s0 = scalar_lea.vmem %s45_s7, 16  ;;  %s501_s10 = scalar_lea.vmem %s45_s7, 32 }
  0x3e   :  { %p498_p13 = scmp.ne.s32.totalorder %s45_s7, %s497_s0  ;;  %p502_p0 = scmp.lt.s32.totalorder %s45_s7, %s45_s7 }
  0x3f   :  { %p503_p1 = scmp.lt.s32.totalorder %s501_s10, %s497_s0 }
  0x41   :  { %p504_p2 = por %p503_p1, %p502_p0 }
  0x43   :  { %p505_p3 = pnand %p504_p2, %p498_p13 }
  0x45   :  { %508 = shalt.err (!%p505_p3)
}
  0x46   :  { %47 = dma.hbm_to_vmem [thread:$0]  %s716_s2, 16, %s45_s7, [#allocation6]  }
  0x47   :  { %s509_s21 = scalar_lea.hbm %s718_s4, 16 }
  0x48   :  { %p510_p4 = scmp.ne.s32.totalorder %s718_s4, %s509_s21  ;;  %p513_p5 = scmp.lt.u32.totalorder %s509_s21, %s718_s4 }
  0x4a   :  { %p515_p6 = pnand %p513_p5, %p510_p4 }
  0x4c   :  { %518 = shalt.err (!%p515_p6)
}
  0x4d   :  { %s519_s26 = scalar_lea.vmem %s65_s9, 16  ;;  %s523_s27 = scalar_lea.vmem %s65_s9, 32 }
  0x4e   :  { %p520_p7 = scmp.ne.s32.totalorder %s65_s9, %s519_s26  ;;  %p524_p8 = scmp.lt.s32.totalorder %s65_s9, %s65_s9 }
  0x4f   :  { %p525_p9 = scmp.lt.s32.totalorder %s523_s27, %s519_s26 }
  0x51   :  { %p526_p10 = por %p525_p9, %p524_p8 }
  0x53   :  { %p527_p11 = pnand %p526_p10, %p520_p7 }
  0x55   :  { %530 = shalt.err (!%p527_p11)
}
  0x56   :  { %67 = dma.hbm_to_vmem [thread:$0]  %s718_s4, 16, %s65_s9, [#allocation9]  }
  0x57   :  { %553 = dma.done.wait [#allocation3], 1024  }
  0x58   :  { %554 = vsyncadd [#allocation3], 4294966272 }
  0x59   :  { %555 = dma.done.wait [#allocation6], 272  }
  0x5a   :  { %556 = vsyncadd [#allocation6], 4294967024 }
  0x5b   :  { %557 = dma.done.wait [#allocation9], 48  }
  0x5c   :  { %558 = vsyncadd [#allocation9], 4294967248  ;;  %v667_v0 = vld [vmem:[#allocation2 + $0x20] sm:$0xff]  ;;  %v669_v1 = vld [vmem:[#allocation2 + $0x28] sm:$0xff]  ;;  %v570_v15 = vmov 0.0|0.0   ;;  %vm571_vm0 = vmmov 0   ;;  %v120_v17 = vlaneseq }
  0x5d   :  { %v671_v2 = vld [vmem:[#allocation2] sm:$0xff]  ;;  %v97_v3 = vadd.f32 %v669_v1, %v667_v0  ;;  %v675_v4 = vld [vmem:[#allocation2 + $0x8] sm:$0xff]  ;;  %v677_v5 = vld [vmem:[#allocation2 + $0x30] sm:$0xff]  ;;  %397 = vmatprep.subr.bf16.mxu0 %v570_v15  ;;  %v572_v16 = vmov 0.0   ;;  %vm131_vm1 = vcmask 130112   ;;  %vm142_vm2 = vcmask 1041409  }
  0x5e   :  { %v679_v6 = vld [vmem:[#allocation2 + $0x38] sm:$0xff]  ;;  %v91_v7 = vadd.f32 %v675_v4, %v671_v2  ;;  %v683_v8 = vld [vmem:[#allocation2 + $0x10] sm:$0xff]  ;;  %v107_v12 = vld [vmem:[#allocation5] sm:$0xff]  ;;  %389 = vmatprep.mubr.msk.f32.mxu0 %vm571_vm0, %v572_v16  ;;  %392 = vmatprep.subr.mxu1 %v572_v16  ;;  %v121_v18 = vand.u32 127, %v120_v17  ;;  %v123_v19 = vshrl.u32 %v120_v17, 7  ;;  %vm144_vm3 = vcmask 130048  }
  0x5f   :  { %v685_v9 = vld [vmem:[#allocation2 + $0x18] sm:$0xff]  ;;  %98 = vadd.xlane.f32.xlu1 %v97_v3  ;;  %v100_v10 = vadd.f32 %v679_v6, %v677_v5  ;;  %v108_v13 = vld [vmem:[#allocation5 + $0x8] sm:$0xff]  ;;  %394 = vmatprep.mubr.msk.f32.mxu1 %vm571_vm0, %v572_v16  ;;  %v224_v38 = vld [vmem:[#allocation8] sm:$0x3]  ;;  %vm236_vm4 = vcmask 1041408   ;;  %vm232_vm5 = vcmask 15360  }
  0x60   :  { %92 = vadd.xlane.f32.xlu0 %v91_v7  ;;  %v94_v11 = vadd.f32 %v685_v9, %v683_v8  ;;  %v398_v14 = vpack.c.bf16 %v108_v13, %v107_v12  ;;  %v126_v20 = vadd.s32 4294967288, %v121_v18  ;;  %v124_v23 = vsub.s32 %v121_v18, %v123_v19  ;;  %393 = vmatpush3.msk.msra.mxu1 %vm236_vm4, %v224_v38  ;;  %v373_v39 = vld [vmem:[#allocation7] ss:$0 sm:$0xff]  ;;  %v376_v48 = vld [vmem:[#allocation10] ss:$0 sm:$0xff]  ;;  %s573_s4 = smov [#allocation11]  }
  0x61   :  { %v318_v55 = vsub.s32 0, %v123_v19  ;;  %v329_v58 = vsub.s32 1, %v123_v19  ;;  %s359_s30 = sshll.u32 %s573_s4, 4  ;;  %s360_s30 = int_to_ptr.vmem [resolvable:$true] %s359_s30 }
  0x62   :  { %399 = vmatpush3.bf16.msra.mxu0 %v398_v14  ;;  %v129_v25 = vsub.s32 %v126_v20, %v123_v19  ;;  %s531_s6 = scalar_lea.vmem %s360_s30, 1024  ;;  %p536_p13 = scmp.lt.s32.totalorder %s360_s30, %s360_s30 }
  0x63   :  { %101 = vadd.xlane.f32.xlu1 %v100_v10  ;;  %p532_p12 = scmp.ne.s32.totalorder %s360_s30, %s531_s6  ;;  %p537_p0 = scmp.lt.s32.totalorder %s531_s6, %s531_s6 }
  0x64   :  { %95 = vadd.xlane.f32.xlu0 %v94_v11 }
  0x65   :  { %p538_p1 = por %p537_p0, %p536_p13 }
  0x67   :  { %p539_p2 = pnand %p538_p1, %p532_p12 }
  0xec   :  { %v99_v21 = vpop.xlane.xlu1 %98 }
  0xed   :  { %v93_v22 = vpop.xlane.xlu0 %92  ;;  %v105_v24 = vmul.f32 0.00390625, %v99_v21 }
  0xee   :  { %v103_v26 = vmul.f32 0.00390625, %v93_v22 }
  0xef   :  { %v136_v31 = vrot.slane %v105_v24, %v124_v23 }
  0xf0   :  { %v102_v27 = vpop.xlane.xlu1 %101  ;;  %v125_v33 = vrot.slane %v103_v26, %v124_v23 }
  0xf1   :  { %v106_v28 = vmul.f32 0.00390625, %v102_v27  ;;  %v96_v29 = vpop.xlane.xlu0 %95 }
  0xf2   :  { %v104_v30 = vmul.f32 0.00390625, %v96_v29 }
  0xf3   :  { %v140_v32 = vrot.slane %v106_v28, %v129_v25 }
  0xf4   :  { %v130_v34 = vrot.slane %v104_v30, %v129_v25 }
  0xf5   :  { %v141_v35 = vsel %vm131_vm1, %v140_v32, %v136_v31 }
  0xf6   :  { %v132_v36 = vsel %vm131_vm1, %v130_v34, %v125_v33 }
  0xf7   :  { %v143_v37 = vsel %vm142_vm2, %v141_v35, %v132_v36 }
  0xf8   :  { %390 = vmatmul.mubr.msk.f32.vlgmr.msra.gmra.mrb[0].mxu0 %vm144_vm3, %v143_v37 }
 0x1cb   :  { %v213_v40 = vpop.f32.mrb[0].mxu0 }
 0x1cc   :  { %v214_v41 = vadd.f32 %v373_v39, %v213_v40  ;;  %v391_v42 = vpop.f32.mrb[1].mxu0 }
 0x1ce   :  { %v375_v43 = vmul.f32 -1.442695, %v214_v41 }
 0x1d0   :  { %413 = vpow2.f32 %v375_v43 }
 0x1da   :  { %v414_v44 = vpop.eup %413 }
 0x1db   :  { %v220_v45 = vadd.f32 1.0, %v414_v44 }
 0x1dd   :  { %415 = vrcp.f32 %v220_v45 }
 0x1e7   :  { %v416_v46 = vpop.eup %415 }
 0x1e8   :  { %v223_v47 = vmul.f32 %v416_v46, %v214_v41 }
 0x1ea   :  { %395 = vmatmul.mubr.msk.f32.vlgmr.msra.gmra.mrb[0].mxu1 %vm232_vm5, %v223_v47 }
 0x2bd   :  { %v306_v49 = vpop.f32.mrb[0].mxu1 }
 0x2be   :  { %v307_v50 = vadd.f32 %v376_v48, %v306_v49  ;;  %v396_v51 = vpop.f32.mrb[1].mxu1 }
 0x2c0   :  { %v379_v52 = vmul.f32 -1.442695, %v307_v50 }
 0x2c2   :  { %417 = vpow2.f32 %v379_v52 }
 0x2cc   :  { %v418_v53 = vpop.eup %417 }
 0x2cd   :  { %v313_v54 = vadd.f32 1.0, %v418_v53 }
 0x2cf   :  { %419 = vrcp.f32 %v313_v54 }
 0x2d9   :  { %v420_v56 = vpop.eup %419 }
 0x2da   :  { %v319_v57 = vrot.slane %v420_v56, %v318_v55  ;;  %v330_v59 = vrot.slane %v420_v56, %v329_v58 }
 0x2dc   :  { %325 = vbcast.lane.b32.xlu1 %v319_v57, 264  ;;  %321 = vbcast.lane.b32.xlu0 %v319_v57, 256 }
 0x2e0   :  { %332 = vbcast.lane.b32.xlu1 %v330_v59, 256 }
 0x2e4   :  { %336 = vbcast.lane.b32.xlu1 %v330_v59, 264 }
 0x34e   :  { %v326_v60 = vpop.permute.xlu1 %325  ;;  %v322_v61 = vpop.permute.xlu0 %321 }
 0x34f   :  { %v340_v62 = vmul.f32 %v326_v60, %v683_v8  ;;  %v341_v63 = vmul.f32 %v326_v60, %v685_v9  ;;  %v338_v3 = vmul.f32 %v322_v61, %v671_v2  ;;  %v339_v7 = vmul.f32 %v322_v61, %v675_v4 }
 0x351   :  { %348 = vst [vmem:[#allocation11 + $0x10] sm:$0xff] %v340_v62  ;;  %349 = vst [vmem:[#allocation11 + $0x18] sm:$0xff] %v341_v63 }
 0x352   :  { %346 = vst [vmem:[#allocation11] sm:$0xff] %v338_v3  ;;  %347 = vst [vmem:[#allocation11 + $0x8] sm:$0xff] %v339_v7  ;;  %v333_v10 = vpop.permute.xlu1 %332 }
 0x353   :  { %v342_v11 = vmul.f32 %v333_v10, %v667_v0  ;;  %v343_v12 = vmul.f32 %v333_v10, %v669_v1 }
 0x355   :  { %350 = vst [vmem:[#allocation11 + $0x20] sm:$0xff] %v342_v11  ;;  %351 = vst [vmem:[#allocation11 + $0x28] sm:$0xff] %v343_v12 }
 0x356   :  { %v337_v8 = vpop.permute.xlu1 %336 }
 0x357   :  { %v344_v9 = vmul.f32 %v337_v8, %v677_v5  ;;  %v345_v2 = vmul.f32 %v337_v8, %v679_v6 }
 0x359   :  { %352 = vst [vmem:[#allocation11 + $0x30] sm:$0xff] %v344_v9  ;;  %353 = vst [vmem:[#allocation11 + $0x38] sm:$0xff] %v345_v2 }
 0x35a   :  { %542 = shalt.err (!%p539_p2)
}
 0x35b   :  { %s543_s9 = scalar_lea.hbm %s719_s5, 1024 }
 0x35c   :  { %p544_p3 = scmp.ne.s32.totalorder %s719_s5, %s543_s9  ;;  %p547_p4 = scmp.lt.u32.totalorder %s543_s9, %s719_s5 }
 0x35e   :  { %p549_p5 = pnand %p547_p4, %p544_p3 }
 0x360   :  { %552 = shalt.err (!%p549_p5)
}
 0x361   :  { %365 = dma.vmem_to_hbm [thread:$0]  %s360_s30, 1024, %s719_s5, [#allocation4], %s566_s3, %s566_s3, %s567_s28  }
 0x362   :  { %559 = dma.done.wait [#allocation4], 1024  }
 0x363   :  { %560 = vsyncadd [#allocation4], 4294966272 }
 0x364   :  { %369 = vsyncpa [#allocation3], 1 }
 0x365   :  { %370 = vsyncpa [#allocation6], 1 }
 0x366   :  { %371 = vsyncpa [#allocation9], 1 }
 0x367   :  { %372 = vsyncpa [#allocation4], 1 }

</bundles_post_ra>
